<compile_context>
chip_gen: v7x
topology: tpu7x:2x2x1
jax: 0.10.0
libtpu: 0.0.40
codegen_flags: <defaults>
</compile_context>

<pallas_src>
import functools

import jax
import jax.numpy as jnp
from jax.experimental import pallas as pl
from jax.experimental.pallas import tpu as pltpu

_F32 = jnp.float32


def _round_up(x, m):
    return (x + m - 1) // m * m


def _vmem_limit(est_bytes):
    # Explicit scoped-VMEM budget: estimate + headroom, clamped below the
    # smallest physical VMEM (v7x: 64 MiB per TensorCore).
    return int(min(max(est_bytes + (4 << 20), 16 << 20), 56 << 20))


# ---------------------------------------------------------------------------
# Phase 1 kernel: row-tiled  x @ w + b  (bias broadcast over rows).
# ---------------------------------------------------------------------------
def _matmul_bias_kernel(x_ref, w_ref, b_ref, o_ref):
    o_ref[...] = (jnp.dot(x_ref[...], w_ref[...],
                          preferred_element_type=jnp.float32)
                  + b_ref[...]).astype(o_ref.dtype)


def _matmul_bias(x, w, b, *, tm_target=256):
    M, K = x.shape
    N = w.shape[1]
    # Aim for >= 2 grid steps when possible (so "parallel" can shard across
    # TensorCores on v7x) while keeping row tiles a multiple of 8 sublanes.
    tm = min(tm_target, max(8, _round_up(pl.cdiv(M, 2), 8)))
    grid_m = pl.cdiv(M, tm)
    M_pad = grid_m * tm
    if M_pad != M:
        x = jnp.pad(x, ((0, M_pad - M), (0, 0)))

    est = 4 * (2 * tm * K + 2 * K * N + 2 * N + 2 * tm * N)
    out = pl.pallas_call(
        _matmul_bias_kernel,
        out_shape=jax.ShapeDtypeStruct((M_pad, N), _F32),
        grid_spec=pltpu.PrefetchScalarGridSpec(
            num_scalar_prefetch=0,
            grid=(grid_m,),
            in_specs=[
                pl.BlockSpec((tm, K), lambda i: (i, 0)),
                pl.BlockSpec((K, N), lambda i: (0, 0)),   # loop-invariant weight
                pl.BlockSpec((1, N), lambda i: (0, 0)),   # loop-invariant bias
            ],
            out_specs=pl.BlockSpec((tm, N), lambda i: (i, 0)),
        ),
        compiler_params=pltpu.CompilerParams(
            dimension_semantics=("parallel",),
            vmem_limit_bytes=_vmem_limit(est)),
    )(x, w, b)
    return out[:M] if M_pad != M else out


# ---------------------------------------------------------------------------
# Phase 2 kernel: streamed GRU recurrence with fused ReLU + policy/value heads.
# grid=(T,), GI streamed per step, h carried in VMEM scratch across grid steps.
# ---------------------------------------------------------------------------
def _gru_step_kernel(gi_ref, h0_ref, whh_ref, bn_ref, whead_ref, bhead_ref,
                     head_ref, hlast_ref, h_scr, *, hidden_pad):
    Hp = hidden_pad
    t = pl.program_id(0)

    @pl.when(t == 0)
    def _():
        h_scr[...] = h0_ref[...]

    h = h_scr[...]
    gi = gi_ref[0]                                   # (B_pad, 3*Hp); b_ih + b_hh[r,z] pre-folded
    gh = jnp.dot(h, whh_ref[...], preferred_element_type=jnp.float32)

    r = jax.nn.sigmoid(gi[:, 0:Hp] + gh[:, 0:Hp])
    z = jax.nn.sigmoid(gi[:, Hp:2 * Hp] + gh[:, Hp:2 * Hp])
    # PyTorch: n = tanh(W_in x + b_in + r * (W_hn h + b_hn))
    n = jnp.tanh(gi[:, 2 * Hp:3 * Hp] + r * (gh[:, 2 * Hp:3 * Hp] + bn_ref[...]))
    h_new = n + z * (h - n)                          # == (1 - z) * n + z * h

    h_scr[...] = h_new
    hlast_ref[...] = h_new                           # constant block index -> written back once

    # Fused heads: relu(h) @ [policy | value | pad], lane-dense (last dim 128).
    a = jnp.maximum(h_new, 0.0)
    head = jnp.dot(a, whead_ref[...], preferred_element_type=jnp.float32) + bhead_ref[...]
    head_ref[0] = head.astype(head_ref.dtype)


def _gru_recurrence_fused_heads(gi, h0, whh, b_n, w_head, b_head):
    T, Bp, H3 = gi.shape
    Hp = whh.shape[0]
    OHp = w_head.shape[1]
    kernel = functools.partial(_gru_step_kernel, hidden_pad=Hp)

    est = 4 * (2 * Bp * H3          # GI block, double-buffered
               + 2 * Hp * H3        # W_hh
               + 2 * Hp * OHp       # W_head
               + 2 * Bp * OHp       # head output block
               + 4 * Bp * Hp        # h0, h_last, h scratch (+slack)
               + 4 * Hp + 4 * OHp)  # biases
    head, h_last = pl.pallas_call(
        kernel,
        out_shape=(jax.ShapeDtypeStruct((T, Bp, OHp), _F32),
                   jax.ShapeDtypeStruct((Bp, Hp), _F32)),
        grid_spec=pltpu.PrefetchScalarGridSpec(
            num_scalar_prefetch=0,
            grid=(T,),
            in_specs=[
                pl.BlockSpec((1, Bp, H3), lambda t: (t, 0, 0)),   # GI streamed over time
                pl.BlockSpec((Bp, Hp), lambda t: (0, 0)),         # h0
                pl.BlockSpec((Hp, H3), lambda t: (0, 0)),         # W_hh^T (gate-aligned pad)
                pl.BlockSpec((1, Hp), lambda t: (0, 0)),          # b_hh[n] only
                pl.BlockSpec((Hp, OHp), lambda t: (0, 0)),        # fused [policy|value] weight
                pl.BlockSpec((1, OHp), lambda t: (0, 0)),         # fused head bias
            ],
            out_specs=[
                pl.BlockSpec((1, Bp, OHp), lambda t: (t, 0, 0)),  # per-step head output
                pl.BlockSpec((Bp, Hp), lambda t: (0, 0)),         # final hidden state
            ],
            scratch_shapes=[pltpu.VMEM((Bp, Hp), _F32)],          # h carry across grid steps
        ),
        compiler_params=pltpu.CompilerParams(
            dimension_semantics=("arbitrary",),   # sequential hidden-state carry
            vmem_limit_bytes=_vmem_limit(est)),
    )(gi, h0, whh, b_n, w_head, b_head)
    return head, h_last


# ---------------------------------------------------------------------------
# Wrapper factory: parameter padding / repacking done ONCE; forward is jitted.
# ---------------------------------------------------------------------------
def make_gru_actor_critic(params, input_size, hidden_size, output_size):
    """Returns a jitted forward(x, h0) -> (dist_logits, value, h_out)."""
    Din, H, O = input_size, hidden_size, output_size
    Din_pad = _round_up(Din, 128)
    H_pad = _round_up(H, 128)
    OH_pad = _round_up(O + 1, 128)       # fused heads: [policy | value | pad]

    # Repack fused gate weights so each gate [r, z, n] starts on a 128-lane
    # boundary (gate slices inside the kernel are free views).
    def pad_gate_cols(w, rows, rows_pad):
        out = jnp.zeros((rows_pad, 3 * H_pad), _F32)
        for g in range(3):
            out = out.at[:rows, g * H_pad:g * H_pad + H].set(w[:, g * H:(g + 1) * H])
        return out

    def pad_gate_bias(b):
        out = jnp.zeros((1, 3 * H_pad), _F32)
        for g in range(3):
            out = out.at[:, g * H_pad:g * H_pad + H].set(b[:, g * H:(g + 1) * H])
        return out

    w_ih_p = pad_gate_cols(params["w_ih_t"], Din, Din_pad)
    w_hh_p = pad_gate_cols(params["w_hh_t"], H, H_pad)
    b_ih_p = pad_gate_bias(params["b_ih"])
    b_hh_p = pad_gate_bias(params["b_hh"])

    # Fold b_ih (all gates) + b_hh (r, z gates) into the Phase-1 bias; b_hh for
    # the n gate stays in the recurrence (PyTorch-exact r * (W_hn h + b_hn)).
    b_gi = b_ih_p.at[:, 0:2 * H_pad].add(b_hh_p[:, 0:2 * H_pad])
    b_n = b_hh_p[:, 2 * H_pad:3 * H_pad]                 # (1, H_pad)

    # Fused, lane-dense head weight/bias: [policy | value | pad].
    w_head = jnp.zeros((H_pad, OH_pad), _F32)
    w_head = w_head.at[:H, :O].set(params["w_pol_t"])
    w_head = w_head.at[:H, O:O + 1].set(params["w_val_t"])
    b_head = jnp.zeros((1, OH_pad), _F32)
    b_head = b_head.at[:, :O].set(params["b_pol"])
    b_head = b_head.at[:, O:O + 1].set(params["b_val"])

    @jax.jit
    def forward(x, h0):
        T, B, _ = x.shape
        B_pad = _round_up(max(B, 8), 8)

        # Zero-padding keeps padded hidden lanes exactly 0 through the network.
        x_p = jnp.zeros((T, B_pad, Din_pad), _F32).at[:, :B, :Din].set(x)
        h0_p = jnp.zeros((B_pad, H_pad), _F32).at[:B, :H].set(h0[0])

        # Phase 1: time-independent input transform, one big MXU matmul.
        gi = _matmul_bias(x_p.reshape(T * B_pad, Din_pad), w_ih_p, b_gi
                          ).reshape(T, B_pad, 3 * H_pad)

        # Phase 2: streamed recurrence with fused ReLU + policy/value heads.
        head, h_last = _gru_recurrence_fused_heads(gi, h0_p, w_hh_p, b_n,
                                                   w_head, b_head)

        logits = head[:, :B, :O]
        val = head[:, :B, O:O + 1]
        h_out = h_last[None, :B, :H]

        # PyTorch: dist = Categorical(logits=self.policy(x).squeeze(0))
        dist_logits = jnp.squeeze(logits, axis=0) if T == 1 else logits
        return dist_logits, val, h_out

    return forward


def make_params(key, input_size, hidden_size, output_size):
    """Deterministic synthetic parameters (PyTorch-shaped, pre-transposed)."""
    ks = jax.random.split(key, 8)
    s = 0.1
    return {
        # nn.GRU: weight_ih_l0 (3H, Din) -> transposed (Din, 3H); gate order [r,z,n]
        "w_ih_t": s * jax.random.normal(ks[0], (input_size, 3 * hidden_size), _F32),
        "w_hh_t": s * jax.random.normal(ks[1], (hidden_size, 3 * hidden_size), _F32),
        "b_ih": s * jax.random.normal(ks[2], (1, 3 * hidden_size), _F32),
        "b_hh": s * jax.random.normal(ks[3], (1, 3 * hidden_size), _F32),
        # nn.Linear(hidden, output): weight (O, H) -> transposed (H, O)
        "w_pol_t": s * jax.random.normal(ks[4], (hidden_size, output_size), _F32),
        "b_pol": s * jax.random.normal(ks[5], (1, output_size), _F32),
        # nn.Linear(hidden, 1): weight (1, H) -> transposed (H, 1)
        "w_val_t": s * jax.random.normal(ks[6], (hidden_size, 1), _F32),
        "b_val": s * jax.random.normal(ks[7], (1, 1), _F32),
    }


def reference_forward(x, h0, p):
    """Pure-JAX reference matching torch.nn.GRU + ReLU + heads."""
    T, B, _ = x.shape
    H = p["w_hh_t"].shape[0]

    def step(h, x_t):
        gi = x_t @ p["w_ih_t"] + p["b_ih"]
        gh = h @ p["w_hh_t"] + p["b_hh"]
        i_r, i_z, i_n = gi[:, :H], gi[:, H:2 * H], gi[:, 2 * H:]
        h_r, h_z, h_n = gh[:, :H], gh[:, H:2 * H], gh[:, 2 * H:]
        r = jax.nn.sigmoid(i_r + h_r)
        z = jax.nn.sigmoid(i_z + h_z)
        n = jnp.tanh(i_n + r * h_n)
        h_new = (1.0 - z) * n + z * h
        return h_new, h_new

    h_last, hs = jax.lax.scan(step, h0[0], x)          # hs: (T, B, H)
    a = jnp.maximum(hs, 0.0)
    val = a @ p["w_val_t"] + p["b_val"]
    logits = a @ p["w_pol_t"] + p["b_pol"]
    dist_logits = jnp.squeeze(logits, axis=0) if T == 1 else logits
    return dist_logits, val, h_last[None]


if __name__ == "__main__":
    # Small shapes consistent with the module's forward: x (seq, batch, input),
    # h (1, batch, hidden).
    T, B = 8, 2
    INPUT_SIZE, HIDDEN_SIZE, OUTPUT_SIZE = 16, 32, 6

    key = jax.random.PRNGKey(0)
    k_x, k_h, k_p = jax.random.split(key, 3)

    x = jax.random.normal(k_x, (T, B, INPUT_SIZE), _F32)
    h0 = jnp.zeros((1, B, HIDDEN_SIZE), _F32)          # init_hidden_state
    params = make_params(k_p, INPUT_SIZE, HIDDEN_SIZE, OUTPUT_SIZE)

    forward = make_gru_actor_critic(params, INPUT_SIZE, HIDDEN_SIZE, OUTPUT_SIZE)
    dist_logits, val, h_out = forward(x, h0)
    jax.block_until_ready((dist_logits, val, h_out))

    # Sanity check against the pure-JAX reference.
    ref_logits, ref_val, ref_h = reference_forward(x, h0, params)
    assert dist_logits.shape == (T, B, OUTPUT_SIZE)
    assert val.shape == (T, B, 1)
    assert h_out.shape == (1, B, HIDDEN_SIZE)
    assert jnp.allclose(dist_logits, ref_logits, atol=1e-5, rtol=1e-5)
    assert jnp.allclose(val, ref_val, atol=1e-5, rtol=1e-5)
    assert jnp.allclose(h_out, ref_h, atol=1e-5, rtol=1e-5)

    # TODO(synk): torch.distributions.Categorical has no Pallas/JAX-core
    # equivalent; the distribution is represented by its logits here.
    print("KERNEL_OK")
</pallas_src>

<mosaic_0001>
module attributes {stable_mosaic.version = 11 : i64} {
  func.func @_matmul_bias_kernel(%arg0: i32, %arg1: memref<32x128xf32, #tpu.memory_space<vmem>>, %arg2: memref<128x384xf32, #tpu.memory_space<vmem>>, %arg3: memref<1x384xf32, #tpu.memory_space<vmem>>, %arg4: memref<32x384xf32, #tpu.memory_space<vmem>>) attributes {dimension_semantics = [#tpu.dimension_semantics<parallel>], iteration_bounds = array<i64: 2>, scalar_prefetch = 0 : i64, scratch_operands = 0 : i64, tpu.core_type = #tpu.core_type<tc>, window_params = [{transform_indices = @transform_0, window_bounds = array<i64: 32, 128>}, {pipeline_mode = #tpu.pipeline_mode<synchronous>, transform_indices = @transform_1, window_bounds = array<i64: 128, 384>}, {pipeline_mode = #tpu.pipeline_mode<synchronous>, transform_indices = @transform_2, window_bounds = array<i64: 1, 384>}, {transform_indices = @transform_3, window_bounds = array<i64: 32, 384>}]} {
    %c0 = arith.constant 0 : index
    %c0_0 = arith.constant 0 : index
    %0 = vector.load %arg1[%c0, %c0_0] : memref<32x128xf32, #tpu.memory_space<vmem>>, vector<32x128xf32>
    %c0_1 = arith.constant 0 : index
    %c0_2 = arith.constant 0 : index
    %1 = vector.load %arg2[%c0_1, %c0_2] : memref<128x384xf32, #tpu.memory_space<vmem>>, vector<128x384xf32>
    %cst = arith.constant dense<0.000000e+00> : vector<32x384xf32>
    %2 = tpu.matmul %0, %1, %cst {dimension_numbers = #tpu.dot_dimension_numbers<[1], [0], [0], [1], [0, 0, 1, 1], [], []>} : vector<32x128xf32>, vector<128x384xf32>, vector<32x384xf32> -> vector<32x384xf32>
    %c0_3 = arith.constant 0 : index
    %c0_4 = arith.constant 0 : index
    %3 = vector.load %arg3[%c0_3, %c0_4] : memref<1x384xf32, #tpu.memory_space<vmem>>, vector<1x384xf32>
    %4 = vector.broadcast %3 : vector<1x384xf32> to vector<32x384xf32>
    %5 = arith.addf %2, %4 : vector<32x384xf32>
    %c0_5 = arith.constant 0 : index
    %c0_6 = arith.constant 0 : index
    %6 = vector.load %arg4[%c0_5, %c0_6] : memref<32x384xf32, #tpu.memory_space<vmem>>, vector<32x384xf32>
    tpu.vector_store %arg4[%c0_5, %c0_6], %5 {strides = array<i32>} : memref<32x384xf32, #tpu.memory_space<vmem>>, vector<32x384xf32>,
    return
  }
  func.func @transform_0(%arg0: i32) -> (i32, i32) {
    %c0_i32 = arith.constant 0 : i32
    %c0_i32_0 = arith.constant 0 : i32
    return %arg0, %c0_i32 : i32, i32
  }
  func.func @transform_1(%arg0: i32) -> (i32, i32) {
    %c0_i32 = arith.constant 0 : i32
    %c0_i32_0 = arith.constant 0 : i32
    %c0_i32_1 = arith.constant 0 : i32
    return %c0_i32, %c0_i32_0 : i32, i32
  }
  func.func @transform_2(%arg0: i32) -> (i32, i32) {
    %c0_i32 = arith.constant 0 : i32
    %c0_i32_0 = arith.constant 0 : i32
    %c0_i32_1 = arith.constant 0 : i32
    return %c0_i32, %c0_i32_0 : i32, i32
  }
  func.func @transform_3(%arg0: i32) -> (i32, i32) {
    %c0_i32 = arith.constant 0 : i32
    %c0_i32_0 = arith.constant 0 : i32
    return %arg0, %c0_i32 : i32, i32
  }
}

module attributes {stable_mosaic.version = 11 : i64} {
  func.func @_gru_step_kernel(%arg0: i32, %arg1: memref<1x8x384xf32, #tpu.memory_space<vmem>>, %arg2: memref<8x128xf32, #tpu.memory_space<vmem>>, %arg3: memref<128x384xf32, #tpu.memory_space<vmem>>, %arg4: memref<1x128xf32, #tpu.memory_space<vmem>>, %arg5: memref<128x128xf32, #tpu.memory_space<vmem>>, %arg6: memref<1x128xf32, #tpu.memory_space<vmem>>, %arg7: memref<1x8x128xf32, #tpu.memory_space<vmem>>, %arg8: memref<8x128xf32, #tpu.memory_space<vmem>>, %arg9: memref<8x128xf32, #tpu.memory_space<vmem>>) attributes {dimension_semantics = [#tpu.dimension_semantics<arbitrary>], iteration_bounds = array<i64: 8>, scalar_prefetch = 0 : i64, scratch_operands = 1 : i64, tpu.core_type = #tpu.core_type<tc>, window_params = [{transform_indices = @transform_0, window_bounds = array<i64: 1, 8, 384>}, {pipeline_mode = #tpu.pipeline_mode<synchronous>, transform_indices = @transform_1, window_bounds = array<i64: 8, 128>}, {pipeline_mode = #tpu.pipeline_mode<synchronous>, transform_indices = @transform_2, window_bounds = array<i64: 128, 384>}, {pipeline_mode = #tpu.pipeline_mode<synchronous>, transform_indices = @transform_3, window_bounds = array<i64: 1, 128>}, {pipeline_mode = #tpu.pipeline_mode<synchronous>, transform_indices = @transform_4, window_bounds = array<i64: 128, 128>}, {pipeline_mode = #tpu.pipeline_mode<synchronous>, transform_indices = @transform_5, window_bounds = array<i64: 1, 128>}, {transform_indices = @transform_6, window_bounds = array<i64: 1, 8, 128>}, {pipeline_mode = #tpu.pipeline_mode<synchronous>, transform_indices = @transform_7, window_bounds = array<i64: 8, 128>}]} {
    %c0_i32 = arith.constant 0 : i32
    %0 = arith.cmpi eq, %arg0, %c0_i32 : i32
    %1 = arith.extui %0 : i1 to i32
    %c0_i32_0 = arith.constant 0 : i32
    %2 = arith.cmpi ne, %1, %c0_i32_0 : i32
    scf.if %2 {
      %c0_24 = arith.constant 0 : index
      %c0_25 = arith.constant 0 : index
      %47 = vector.load %arg2[%c0_24, %c0_25] : memref<8x128xf32, #tpu.memory_space<vmem>>, vector<8x128xf32>
      %c0_26 = arith.constant 0 : index
      %c0_27 = arith.constant 0 : index
      %48 = vector.load %arg9[%c0_26, %c0_27] : memref<8x128xf32, #tpu.memory_space<vmem>>, vector<8x128xf32>
      tpu.vector_store %arg9[%c0_26, %c0_27], %47 {strides = array<i32>} : memref<8x128xf32, #tpu.memory_space<vmem>>, vector<8x128xf32>,
    } else {
    }
    %c0 = arith.constant 0 : index
    %c0_1 = arith.constant 0 : index
    %3 = vector.load %arg9[%c0, %c0_1] : memref<8x128xf32, #tpu.memory_space<vmem>>, vector<8x128xf32>
    %c0_2 = arith.constant 0 : index
    %c0_3 = arith.constant 0 : index
    %c0_4 = arith.constant 0 : index
    %4 = vector.load %arg1[%c0_2, %c0_3, %c0_4] : memref<1x8x384xf32, #tpu.memory_space<vmem>>, vector<1x8x384xf32>
    %5 = vector.shape_cast %4 : vector<1x8x384xf32> to vector<8x384xf32>
    %c0_5 = arith.constant 0 : index
    %c0_6 = arith.constant 0 : index
    %6 = vector.load %arg3[%c0_5, %c0_6] : memref<128x384xf32, #tpu.memory_space<vmem>>, vector<128x384xf32>
    %cst = arith.constant dense<0.000000e+00> : vector<8x384xf32>
    %7 = tpu.matmul %3, %6, %cst {dimension_numbers = #tpu.dot_dimension_numbers<[1], [0], [0], [1], [0, 0, 1, 1], [], []>} : vector<8x128xf32>, vector<128x384xf32>, vector<8x384xf32> -> vector<8x384xf32>
    %8 = vector.extract_strided_slice %5 {offsets = [0, 0], sizes = [8, 128], strides = [1, 1]} : vector<8x384xf32> to vector<8x128xf32>
    %9 = vector.extract_strided_slice %7 {offsets = [0, 0], sizes = [8, 128], strides = [1, 1]} : vector<8x384xf32> to vector<8x128xf32>
    %10 = arith.addf %8, %9 : vector<8x128xf32>
    %11 = arith.negf %10 : vector<8x128xf32>
    %12 = math.exp %11 : vector<8x128xf32>
    %cst_7 = arith.constant 1.000000e+00 : f32
    %13 = vector.broadcast %cst_7 : f32 to vector<8x128xf32>
    %14 = arith.addf %13, %12 : vector<8x128xf32>
    %15 = arith.divf %13, %14 : vector<8x128xf32>
    %16 = vector.extract_strided_slice %5 {offsets = [0, 128], sizes = [8, 128], strides = [1, 1]} : vector<8x384xf32> to vector<8x128xf32>
    %17 = vector.extract_strided_slice %7 {offsets = [0, 128], sizes = [8, 128], strides = [1, 1]} : vector<8x384xf32> to vector<8x128xf32>
    %18 = arith.addf %16, %17 : vector<8x128xf32>
    %19 = arith.negf %18 : vector<8x128xf32>
    %20 = math.exp %19 : vector<8x128xf32>
    %cst_8 = arith.constant 1.000000e+00 : f32
    %21 = vector.broadcast %cst_8 : f32 to vector<8x128xf32>
    %22 = arith.addf %21, %20 : vector<8x128xf32>
    %23 = arith.divf %21, %22 : vector<8x128xf32>
    %24 = vector.extract_strided_slice %5 {offsets = [0, 256], sizes = [8, 128], strides = [1, 1]} : vector<8x384xf32> to vector<8x128xf32>
    %25 = vector.extract_strided_slice %7 {offsets = [0, 256], sizes = [8, 128], strides = [1, 1]} : vector<8x384xf32> to vector<8x128xf32>
    %c0_9 = arith.constant 0 : index
    %c0_10 = arith.constant 0 : index
    %26 = vector.load %arg4[%c0_9, %c0_10] : memref<1x128xf32, #tpu.memory_space<vmem>>, vector<1x128xf32>
    %27 = vector.broadcast %26 : vector<1x128xf32> to vector<8x128xf32>
    %28 = arith.addf %25, %27 : vector<8x128xf32>
    %29 = arith.mulf %15, %28 : vector<8x128xf32>
    %30 = arith.addf %24, %29 : vector<8x128xf32>
    %31 = math.tanh %30 : vector<8x128xf32>
    %32 = arith.subf %3, %31 : vector<8x128xf32>
    %33 = arith.mulf %23, %32 : vector<8x128xf32>
    %34 = arith.addf %31, %33 : vector<8x128xf32>
    %c0_11 = arith.constant 0 : index
    %c0_12 = arith.constant 0 : index
    %35 = vector.load %arg9[%c0_11, %c0_12] : memref<8x128xf32, #tpu.memory_space<vmem>>, vector<8x128xf32>
    tpu.vector_store %arg9[%c0_11, %c0_12], %34 {strides = array<i32>} : memref<8x128xf32, #tpu.memory_space<vmem>>, vector<8x128xf32>,
    %c0_13 = arith.constant 0 : index
    %c0_14 = arith.constant 0 : index
    %36 = vector.load %arg8[%c0_13, %c0_14] : memref<8x128xf32, #tpu.memory_space<vmem>>, vector<8x128xf32>
    tpu.vector_store %arg8[%c0_13, %c0_14], %34 {strides = array<i32>} : memref<8x128xf32, #tpu.memory_space<vmem>>, vector<8x128xf32>,
    %cst_15 = arith.constant 0.000000e+00 : f32
    %37 = vector.broadcast %cst_15 : f32 to vector<8x128xf32>
    %38 = arith.maximumf %34, %37 : vector<8x128xf32>
    %c0_16 = arith.constant 0 : index
    %c0_17 = arith.constant 0 : index
    %39 = vector.load %arg5[%c0_16, %c0_17] : memref<128x128xf32, #tpu.memory_space<vmem>>, vector<128x128xf32>
    %cst_18 = arith.constant dense<0.000000e+00> : vector<8x128xf32>
    %40 = tpu.matmul %38, %39, %cst_18 {dimension_numbers = #tpu.dot_dimension_numbers<[1], [0], [0], [1], [0, 0, 1, 1], [], []>} : vector<8x128xf32>, vector<128x128xf32>, vector<8x128xf32> -> vector<8x128xf32>
    %c0_19 = arith.constant 0 : index
    %c0_20 = arith.constant 0 : index
    %41 = vector.load %arg6[%c0_19, %c0_20] : memref<1x128xf32, #tpu.memory_space<vmem>>, vector<1x128xf32>
    %42 = vector.broadcast %41 : vector<1x128xf32> to vector<8x128xf32>
    %43 = arith.addf %40, %42 : vector<8x128xf32>
    %c0_21 = arith.constant 0 : index
    %c0_22 = arith.constant 0 : index
    %c0_23 = arith.constant 0 : index
    %44 = vector.load %arg7[%c0_21, %c0_22, %c0_23] : memref<1x8x128xf32, #tpu.memory_space<vmem>>, vector<1x8x128xf32>
    %45 = vector.shape_cast %44 : vector<1x8x128xf32> to vector<8x128xf32>
    %46 = vector.shape_cast %43 : vector<8x128xf32> to vector<1x8x128xf32>
    tpu.vector_store %arg7[%c0_21, %c0_22, %c0_23], %46 {strides = array<i32>} : memref<1x8x128xf32, #tpu.memory_space<vmem>>, vector<1x8x128xf32>,
    return
  }
  func.func @transform_0(%arg0: i32) -> (i32, i32, i32) {
    %c0_i32 = arith.constant 0 : i32
    %c0_i32_0 = arith.constant 0 : i32
    %c0_i32_1 = arith.constant 0 : i32
    return %arg0, %c0_i32, %c0_i32_0 : i32, i32, i32
  }
  func.func @transform_1(%arg0: i32) -> (i32, i32) {
    %c0_i32 = arith.constant 0 : i32
    %c0_i32_0 = arith.constant 0 : i32
    %c0_i32_1 = arith.constant 0 : i32
    return %c0_i32, %c0_i32_0 : i32, i32
  }
  func.func @transform_2(%arg0: i32) -> (i32, i32) {
    %c0_i32 = arith.constant 0 : i32
    %c0_i32_0 = arith.constant 0 : i32
    %c0_i32_1 = arith.constant 0 : i32
    return %c0_i32, %c0_i32_0 : i32, i32
  }
  func.func @transform_3(%arg0: i32) -> (i32, i32) {
    %c0_i32 = arith.constant 0 : i32
    %c0_i32_0 = arith.constant 0 : i32
    %c0_i32_1 = arith.constant 0 : i32
    return %c0_i32, %c0_i32_0 : i32, i32
  }
  func.func @transform_4(%arg0: i32) -> (i32, i32) {
    %c0_i32 = arith.constant 0 : i32
    %c0_i32_0 = arith.constant 0 : i32
    %c0_i32_1 = arith.constant 0 : i32
    return %c0_i32, %c0_i32_0 : i32, i32
  }
  func.func @transform_5(%arg0: i32) -> (i32, i32) {
    %c0_i32 = arith.constant 0 : i32
    %c0_i32_0 = arith.constant 0 : i32
    %c0_i32_1 = arith.constant 0 : i32
    return %c0_i32, %c0_i32_0 : i32, i32
  }
  func.func @transform_6(%arg0: i32) -> (i32, i32, i32) {
    %c0_i32 = arith.constant 0 : i32
    %c0_i32_0 = arith.constant 0 : i32
    %c0_i32_1 = arith.constant 0 : i32
    return %arg0, %c0_i32, %c0_i32_0 : i32, i32, i32
  }
  func.func @transform_7(%arg0: i32) -> (i32, i32) {
    %c0_i32 = arith.constant 0 : i32
    %c0_i32_0 = arith.constant 0 : i32
    %c0_i32_1 = arith.constant 0 : i32
    return %c0_i32, %c0_i32_0 : i32, i32
  }
}

</mosaic_0001>

<bundles_post_ra>
// kernel: forward.3
= control target key start
LH: loop header
LB: loop body
LE: loop exit
PB: predicated region body
PF: predicated region fallthrough
CT: control target
= control target key end

     0   :  { %s929_s24 = smov 0   ;;  %s1184_s0 = inlined_call_operand.vmem [shape: f32[8,8,384], index: 0, kind: input, shape index: {}]   ;;  %s1185_s1 = inlined_call_operand.vmem [shape: f32[8,128], index: 1, kind: input, shape index: {}]   ;;  %s1186_s2 = inlined_call_operand.vmem [shape: f32[128,384], index: 2, kind: input, shape index: {}]   ;;  %s1187_s3 = inlined_call_operand.vmem [shape: f32[1,128], index: 3, kind: input, shape index: {}]   ;;  %s1188_s4 = inlined_call_operand.vmem [shape: f32[128,128], index: 4, kind: input, shape index: {}]   ;;  %s1189_s5 = inlined_call_operand.vmem [shape: f32[1,128], index: 5, kind: input, shape index: {}]   ;;  %s1190_s6 = inlined_call_operand.vmem [shape: f32[8,8,128], index: 6, kind: output, shape index: {0}]   ;;  %s1191_s7 = inlined_call_operand.vmem [shape: f32[8,128], index: 7, kind: output, shape index: {1}]  }
   0x1 LB: > { %s658_s25 = sadd.s32 4294967295, %s884_s24   ;;  %p662_p0 = scmp.ge.s32.totalorder %s884_s24, 1  ;;  %s884_s24 = sphi %s929_s24, %s18_s24  }
   0x2   : > { %p235_p1 = scmp.lt.s32.totalorder %s884_s24, 9 }
   0x4   : > { %p236_p2 = pnand %p662_p0, %p235_p1 }
   0x5   : > { %p266_p3 = scmp.lt.s32.totalorder (!%p236_p2), %s658_s25, 7  ;;  %p665_p4 = scmp.ne.s32.totalorder (!%p236_p2), %s658_s25, 0 }
   0x6   : > { %239 = sbr.rel (%p236_p2) target bundleno = 534 (0x216), region = 44 }
   0xd   : > { %s267_s26 = scalar_select %p266_p3, %s658_s25, 7 }
   0xe   : > { %278 = sbr.rel (%p665_p4) target bundleno = 21 (0x15), region = 48  ;;  %v279_v0 = vld [vmem:[%s1185_s1] sm:$0xff] (!%p665_p4) }
   0xf   : > { %s856_s27 = smul.u32 24, %s267_s26  ;;  %s664_s28 = sshll.u32 %s267_s26, 3  ;;  %280 = vst [vmem:[#allocation2] sm:$0xff] (!%p665_p4), %v279_v0 }
  0x10   : > { %s940_s8 = scalar_lea.vmem %s1190_s6, %s664_s28 }
  0x11   : > { %s945_s11 = scalar_lea.vmem %s1184_s0, %s856_s27 }
  0x15 PF: > { %v286_v1 = vld [vmem:[%s1186_s2 + $0x8] sm:$0xff]  ;;  %v289_v2 = vld [vmem:[%s1186_s2 + $0x20] sm:$0xff]  ;;  %v288_v5 = vld [vmem:[%s1186_s2 + $0x18] sm:$0xff]  ;;  %v886_v8 = vmov 0.0|0.0   ;;  %v887_v9 = vmov 0.0   ;;  %vm888_vm0 = vmmov 0  }
  0x16   : > { %v285_v3 = vld [vmem:[%s1186_s2] sm:$0xff]  ;;  %v776_v4 = vpack.c.bf16 %v289_v2, %v286_v1  ;;  %v292_v6 = vld [vmem:[%s1186_s2 + $0x38] sm:$0xff]  ;;  %v295_v7 = vld [vmem:[%s1186_s2 + $0x50] sm:$0xff]  ;;  %808 = vmatprep.subr.bf16.mxu1 %v886_v8  ;;  %397 = vmatprep.mubr.f32.mxu0 %v887_v9 }
  0x17   : > { %v778_v10 = vpack.c.bf16 %v288_v5, %v285_v3  ;;  %v780_v11 = vpack.c.bf16 %v295_v7, %v292_v6  ;;  %v291_v12 = vld [vmem:[%s1186_s2 + $0x30] sm:$0xff]  ;;  %v294_v13 = vld [vmem:[%s1186_s2 + $0x48] sm:$0xff]  ;;  %738 = vmatprep.mubr.msk.f32.mxu1 %vm888_vm0, %v887_v9  ;;  %v301_v15 = vld [vmem:[%s1186_s2 + $0x80] sm:$0xff] }
  0x18   : > { %v298_v14 = vld [vmem:[%s1186_s2 + $0x68] sm:$0xff]  ;;  %777 = vmatprep.subr.bf16.mxu0 %v776_v4  ;;  %v782_v16 = vpack.c.bf16 %v294_v13, %v291_v12  ;;  %v297_v18 = vld [vmem:[%s1186_s2 + $0x60] sm:$0xff]  ;;  %v300_v19 = vld [vmem:[%s1186_s2 + $0x78] sm:$0xff] }
  0x19   : > { %779 = vmatpush1.bf16.msra.mxu0 %v778_v10  ;;  %v784_v17 = vpack.c.bf16 %v301_v15, %v298_v14  ;;  %v304_v20 = vld [vmem:[%s1186_s2 + $0x98] sm:$0xff]  ;;  %v307_v21 = vld [vmem:[%s1186_s2 + $0xb0] sm:$0xff]  ;;  %v786_v22 = vpack.c.bf16 %v300_v19, %v297_v18  ;;  %v306_v25 = vld [vmem:[%s1186_s2 + $0xa8] sm:$0xff] }
  0x1a   : > { %781 = vmatprep.subr.bf16.mxu0 %v780_v11  ;;  %v303_v23 = vld [vmem:[%s1186_s2 + $0x90] sm:$0xff]  ;;  %v788_v24 = vpack.c.bf16 %v307_v21, %v304_v20  ;;  %v290_v27 = vld [vmem:[%s1186_s2 + $0x28] sm:$0xff]  ;;  %v313_v29 = vld [vmem:[%s1186_s2 + $0xe0] sm:$0xff] }
  0x1b   : > { %v287_v26 = vld [vmem:[%s1186_s2 + $0x10] sm:$0xff]  ;;  %v310_v28 = vld [vmem:[%s1186_s2 + $0xc8] sm:$0xff]  ;;  %v293_v31 = vld [vmem:[%s1186_s2 + $0x40] sm:$0xff]  ;;  %v790_v33 = vpack.c.bf16 %v306_v25, %v303_v23 }
  0x1c   : > { %v809_v30 = vpack.c.bf16 %v290_v27, %v287_v26  ;;  %v296_v32 = vld [vmem:[%s1186_s2 + $0x58] sm:$0xff]  ;;  %v309_v34 = vld [vmem:[%s1186_s2 + $0xc0] sm:$0xff]  ;;  %v792_v36 = vpack.c.bf16 %v313_v29, %v310_v28  ;;  %v299_v38 = vld [vmem:[%s1186_s2 + $0x70] sm:$0xff] }
  0x1d   : > { %783 = vmatpush1.bf16.msra.mxu0 %v782_v16  ;;  %v812_v35 = vpack.c.bf16 %v296_v32, %v293_v31  ;;  %v312_v37 = vld [vmem:[%s1186_s2 + $0xd8] sm:$0xff]  ;;  %v302_v39 = vld [vmem:[%s1186_s2 + $0x88] sm:$0xff]  ;;  %v319_v41 = vld [vmem:[%s1186_s2 + $0x110] sm:$0xff] }
  0x1e   : > { %785 = vmatprep.subr.bf16.mxu0 %v784_v17  ;;  %810 = vmatpush3.bf16.msra.mxu1 %v809_v30  ;;  %v316_v40 = vld [vmem:[%s1186_s2 + $0xf8] sm:$0xff]  ;;  %v794_v42 = vpack.c.bf16 %v312_v37, %v309_v34  ;;  %v315_v43 = vld [vmem:[%s1186_s2 + $0xf0] sm:$0xff]  ;;  %v815_v44 = vpack.c.bf16 %v302_v39, %v299_v38  ;;  %v318_v46 = vld [vmem:[%s1186_s2 + $0x108] sm:$0xff] }
  0x1f   : > { %811 = vmatprep.subr.bf16.mxu1 %v886_v8  ;;  %v796_v45 = vpack.c.bf16 %v319_v41, %v316_v40  ;;  %v305_v47 = vld [vmem:[%s1186_s2 + $0xa0] sm:$0xff]  ;;  %v308_v48 = vld [vmem:[%s1186_s2 + $0xb8] sm:$0xff]  ;;  %v322_v49 = vld [vmem:[%s1186_s2 + $0x128] sm:$0xff]  ;;  %v798_v51 = vpack.c.bf16 %v318_v46, %v315_v43 }
  0x20   : > { %v325_v50 = vld [vmem:[%s1186_s2 + $0x140] sm:$0xff]  ;;  %v818_v53 = vpack.c.bf16 %v308_v48, %v305_v47  ;;  %v324_v55 = vld [vmem:[%s1186_s2 + $0x138] sm:$0xff]  ;;  %v311_v56 = vld [vmem:[%s1186_s2 + $0xd0] sm:$0xff] }
  0x21   : > { %787 = vmatpush1.bf16.msra.mxu0 %v786_v22  ;;  %v321_v52 = vld [vmem:[%s1186_s2 + $0x120] sm:$0xff]  ;;  %v800_v54 = vpack.c.bf16 %v325_v50, %v322_v49  ;;  %v314_v57 = vld [vmem:[%s1186_s2 + $0xe8] sm:$0xff]  ;;  %v328_v58 = vld [vmem:[%s1186_s2 + $0x158] sm:$0xff] }
  0x22   : > { %789 = vmatprep.subr.bf16.mxu0 %v788_v24  ;;  %813 = vmatpush3.bf16.msra.mxu1 %v812_v35  ;;  %v331_v59 = vld [vmem:[%s1186_s2 + $0x170] sm:$0xff]  ;;  %v802_v60 = vpack.c.bf16 %v324_v55, %v321_v52  ;;  %v821_v62 = vpack.c.bf16 %v314_v57, %v311_v56  ;;  %v330_v0 = vld [vmem:[%s1186_s2 + $0x168] sm:$0xff]  ;;  %v317_v1 = vld [vmem:[%s1186_s2 + $0x100] sm:$0xff] }
  0x23   : > { %814 = vmatprep.subr.bf16.mxu1 %v886_v8  ;;  %v327_v61 = vld [vmem:[%s1186_s2 + $0x150] sm:$0xff]  ;;  %v804_v63 = vpack.c.bf16 %v331_v59, %v328_v58  ;;  %v320_v2 = vld [vmem:[%s1186_s2 + $0x118] sm:$0xff]  ;;  %v326_v6 = vld [vmem:[%s1186_s2 + $0x148] sm:$0xff] }
  0x24   : > { %v806_v3 = vpack.c.bf16 %v330_v0, %v327_v61  ;;  %v824_v4 = vpack.c.bf16 %v320_v2, %v317_v1  ;;  %v323_v5 = vld [vmem:[%s1186_s2 + $0x130] sm:$0xff]  ;;  %v1097_v7 = vld [vmem:[#allocation2] sm:$0xff]  ;;  %v332_v12 = vld [vmem:[%s1186_s2 + $0x178] sm:$0xff] }
  0x25   : > { %791 = vmatpush1.bf16.msra.mxu0 %v790_v33  ;;  %v827_v10 = vpack.c.bf16 %v326_v6, %v323_v5  ;;  %v329_v11 = vld [vmem:[%s1186_s2 + $0x160] sm:$0xff]  ;;  %v506_v15 = vld [vmem:[%s1188_s4 + $0x8] sm:$0xff]  ;;  %v508_v17 = vld [vmem:[%s1188_s4 + $0x18] sm:$0xff] }
  0x26   : > { %793 = vmatprep.subr.bf16.mxu0 %v792_v36  ;;  %816 = vmatpush3.bf16.msra.mxu1 %v815_v44  ;;  %v830_v13 = vpack.c.bf16 %v332_v12, %v329_v11  ;;  %v505_v14 = vld [vmem:[%s1188_s4] sm:$0xff]  ;;  %v510_v20 = vld [vmem:[%s1188_s4 + $0x28] sm:$0xff]  ;;  %v511_v22 = vld [vmem:[%s1188_s4 + $0x30] sm:$0xff] }
  0x27   : > { %817 = vmatprep.subr.bf16.mxu1 %v886_v8  ;;  %v833_v16 = vpack.c.bf16 %v506_v15, %v505_v14  ;;  %v509_v19 = vld [vmem:[%s1188_s4 + $0x20] sm:$0xff]  ;;  %v512_v23 = vld [vmem:[%s1188_s4 + $0x38] sm:$0xff]  ;;  %v514_v26 = vld [vmem:[%s1188_s4 + $0x48] sm:$0xff] }
  0x28   : > { %v839_v21 = vpack.c.bf16 %v510_v20, %v509_v19  ;;  %v842_v24 = vpack.c.bf16 %v512_v23, %v511_v22  ;;  %v513_v25 = vld [vmem:[%s1188_s4 + $0x40] sm:$0xff]  ;;  %v515_v28 = vld [vmem:[%s1188_s4 + $0x50] sm:$0xff]  ;;  %v516_v29 = vld [vmem:[%s1188_s4 + $0x58] sm:$0xff] }
  0x29   : > { %795 = vmatpush1.bf16.msra.mxu0 %v794_v42  ;;  %v845_v27 = vpack.c.bf16 %v514_v26, %v513_v25  ;;  %v848_v30 = vpack.c.bf16 %v516_v29, %v515_v28  ;;  %v517_v31 = vld [vmem:[%s1188_s4 + $0x60] sm:$0xff]  ;;  %v518_v32 = vld [vmem:[%s1188_s4 + $0x68] sm:$0xff]  ;;  %v519_v34 = vld [vmem:[%s1188_s4 + $0x70] sm:$0xff] }
  0x2a   : > { %797 = vmatprep.subr.bf16.mxu0 %v796_v45  ;;  %819 = vmatpush3.bf16.msra.mxu1 %v818_v53  ;;  %v851_v33 = vpack.c.bf16 %v518_v32, %v517_v31  ;;  %v520_v35 = vld [vmem:[%s1188_s4 + $0x78] sm:$0xff]  ;;  %v282_v37 = vld [vmem:[%s945_s11] sm:$0xff]  ;;  %v283_v42 = vld [vmem:[%s945_s11 + $0x8] sm:$0xff] }
  0x2b   : > { %820 = vmatprep.subr.bf16.mxu1 %v886_v8  ;;  %v854_v36 = vpack.c.bf16 %v520_v35, %v519_v34  ;;  %v284_v52 = vld [vmem:[%s945_s11 + $0x10] sm:$0xff] }
  0x2d   : > { %799 = vmatpush1.bf16.msra.mxu0 %v798_v51 }
  0x2e   : > { %801 = vmatprep.subr.bf16.mxu0 %v800_v54  ;;  %822 = vmatpush3.bf16.msra.mxu1 %v821_v62  ;;  %v669_v62 = vld [vmem:[%s1189_s5] ss:$0 sm:$0xff] }
  0x2f   : > { %823 = vmatprep.subr.bf16.mxu1 %v886_v8 }
  0x31   : > { %803 = vmatpush1.bf16.msra.mxu0 %v802_v60 }
  0x32   : > { %805 = vmatprep.subr.bf16.mxu0 %v804_v63  ;;  %825 = vmatpush3.bf16.msra.mxu1 %v824_v4 }
  0x33   : > { %826 = vmatprep.subr.bf16.mxu1 %v886_v8 }
  0x35   : > { %807 = vmatpush1.bf16.msra.mxu0 %v806_v3 }
  0x36   : > { %832 = vmatprep.subr.bf16.mxu0 %v886_v8  ;;  %828 = vmatpush3.bf16.msra.mxu1 %v827_v10 }
  0x37   : > { %829 = vmatprep.subr.bf16.mxu1 %v886_v8 }
  0x38   : > { %398 = vmatmul.mubr.f32.vlgmr.msra.gmra.mrb[0].mxu0 %v1097_v7 }
  0x39   : > { %773 = vmatprep.mubr.msk.f32.mxu0 %vm888_vm0, %v887_v9  ;;  %834 = vmatpush3.bf16.msra.mxu0 %v833_v16  ;;  %v507_v9 = vld [vmem:[%s1188_s4 + $0x10] sm:$0xff] }
  0x3a   : > { %831 = vmatpush3.bf16.msra.mxu1 %v830_v13  ;;  %835 = vmatprep.subr.bf16.mxu0 %v886_v8  ;;  %v836_v18 = vpack.c.bf16 %v508_v17, %v507_v9 }
  0x3d   : > { %739 = vmatmul.mubr.f32.vlgmr.msra.gmra.mrb[0].mxu1 %v1097_v7  ;;  %837 = vmatpush3.bf16.msra.mxu0 %v836_v18 }
  0x3e   : > { %838 = vmatprep.subr.bf16.mxu0 %v886_v8 }
  0x41   : > { %840 = vmatpush3.bf16.msra.mxu0 %v839_v21 }
  0x42   : > { %841 = vmatprep.subr.bf16.mxu0 %v886_v8 }
  0x45   : > { %843 = vmatpush3.bf16.msra.mxu0 %v842_v24 }
  0x46   : > { %844 = vmatprep.subr.bf16.mxu0 %v886_v8 }
  0x49   : > { %846 = vmatpush3.bf16.msra.mxu0 %v845_v27 }
  0x4a   : > { %847 = vmatprep.subr.bf16.mxu0 %v886_v8 }
  0x4d   : > { %849 = vmatpush3.bf16.msra.mxu0 %v848_v30 }
  0x4e   : > { %850 = vmatprep.subr.bf16.mxu0 %v886_v8 }
  0x51   : > { %852 = vmatpush3.bf16.msra.mxu0 %v851_v33 }
  0x52   : > { %853 = vmatprep.subr.bf16.mxu0 %v886_v8  ;;  %v668_v8 = vld [vmem:[%s1187_s3] ss:$0 sm:$0xff] }
  0x55   : > { %855 = vmatpush3.bf16.msra.mxu0 %v854_v36 }
 0x10b   : > { %v399_v38 = vpop.f32.mrb[0].mxu0 }
 0x10c   : > { %v474_v39 = vadd.f32 %v399_v38, %v282_v37  ;;  %v401_v40 = vpop.f32.mrb[1].mxu0 }
 0x10d   : > { %v481_v44 = vadd.f32 %v401_v40, %v283_v42 }
 0x10e   : > { %v666_v41 = vmul.f32 -1.442695, %v474_v39 }
 0x10f   : > { %v667_v46 = vmul.f32 -1.442695, %v481_v44 }
 0x110   : > { %868 = vpow2.f32 %v666_v41  ;;  %v470_v43 = vpop.f32.mrb[0].mxu1 }
 0x111   : > { %v740_v45 = vpop.f32.mrb[1].mxu1  ;;  %870 = vpow2.f32 %v667_v46  ;;  %v495_v49 = vadd.f32 %v668_v8, %v470_v43 }
 0x11a   : > { %v869_v47 = vpop.eup %868 }
 0x11b   : > { %v478_v48 = vadd.f32 1.0, %v869_v47  ;;  %v871_v50 = vpop.eup %870 }
 0x11c   : > { %v485_v54 = vadd.f32 1.0, %v871_v50 }
 0x11d   : > { %872 = vrcp.f32 %v478_v48 }
 0x127   : > { %v873_v51 = vpop.eup %872 }
 0x128   : > { %v496_v53 = vmul.f32 %v873_v51, %v495_v49 }
 0x12a   : > { %v497_v55 = vadd.f32 %v496_v53, %v284_v52 }
 0x12c   : > { %874 = vtanh.f32 %v497_v55 }
 0x12d   : > { %876 = vrcp.f32 %v485_v54 }
 0x136   : > { %v875_v56 = vpop.eup %874 }
 0x137   : > { %v499_v57 = vsub.f32 %v1097_v7, %v875_v56  ;;  %v877_v58 = vpop.eup %876 }
 0x139   : > { %v500_v59 = vmul.f32 %v877_v58, %v499_v57 }
 0x13b   : > { %v501_v60 = vadd.f32 %v875_v56, %v500_v59 }
 0x13d   : > { %502 = vst [vmem:[#allocation2] sm:$0xff] %v501_v60  ;;  %503 = vst [vmem:[%s1191_s7] sm:$0xff] %v501_v60  ;;  %v504_v61 = vmax.f32 %v501_v60, 0.0 }
 0x13f   : > { %774 = vmatmul.mubr.f32.vlgmr.msra.gmra.mrb[2].mxu0 %v504_v61 }
 0x212   : > { %v594_v63 = vpop.f32.mrb[2].mxu0 }
 0x213   : > { %v595_v0 = vadd.f32 %v669_v62, %v594_v63  ;;  %v775_v1 = vpop.f32.mrb[3].mxu0 }
 0x215   : > { %598 = vst [vmem:[%s940_s8] sm:$0xff] %v595_v0 }
 0x216 PF: > { %s18_s24 = sadd.s32 1, %s884_s24  }
 0x217   : > { %p15_p5 = scmp.ge.s32.totalorder %s18_s24, 10  }
 0x219   :  { %17 = sbr.rel (!%p15_p5) target bundleno = 1 (0x1), region = 86 }

// kernel: forward.2
= control target key start
LH: loop header
LB: loop body
LE: loop exit
PB: predicated region body
PF: predicated region fallthrough
CT: control target
= control target key end

     0   :  { %8 = vsyncpa [#allocation3], 0  ;;  %s738_s12 = smov 0   ;;  %s834_s0 = inlined_call_operand.vmem [shape: f32[64,128], index: 0, kind: input, shape index: {}]   ;;  %s835_s1 = inlined_call_operand.hbm [shape: f32[128,384], index: 1, kind: input, shape index: {}]   ;;  %s836_s2 = inlined_call_operand.vmem [shape: f32[1,384], index: 2, kind: input, shape index: {}]   ;;  %s837_s3 = inlined_call_operand.vmem [shape: f32[64,384], index: 3, kind: output, shape index: {}]  }
   0x1 LB: > { %s516_s13 = sadd.s32 4294967295, %s712_s12   ;;  %p518_p0 = scmp.ge.s32.totalorder %s712_s12, 1  ;;  %s712_s12 = sphi %s738_s12, %s14_s12  }
   0x2   : > { %p113_p1 = scmp.lt.s32.totalorder %s712_s12, 3  ;;  %s714_s14 = smov [#allocation2]  }
   0x3   : > { %s125_s15 = sshll.u32 %s714_s14, 4  ;;  %p752_p3 = scmp.eq.s32.totalorder %s516_s13, 0  ;;  %s126_s15 = int_to_ptr.vmem [resolvable:$true] %s125_s15 }
   0x4   : > { %p746_p2 = pnand %p518_p0, %p113_p1  ;;  %s674_s21 = scalar_lea.hbm %s835_s1, 6144 }
   0x5   : > { %s842_s17 = scalar_select %p752_p3, 1, 0 }
   0x6   : > { %s841_s16 = scalar_select %p746_p2, 1, 0 }
   0x7   : > { %p656_p4 = pneg %p746_p2  ;;  %p675_p6 = scmp.ne.s32.totalorder %s835_s1, %s674_s21 }
   0x8   : > { %p681_p10 = scmp.lt.u32.totalorder %s674_s21, %s835_s1 }
   0x9   : > { %p760_p5 = pnand %p752_p3, %p656_p4 }
   0xb   : > { %p676_p7 = pneg %p760_p5 }
   0xd   : > { %p677_p8 = pnand %p676_p7, %p675_p6 }
   0xf   : > { %p678_p9 = pneg %p677_p8 }
  0x11   : > { %p683_p11 = pnand %p681_p10, %p678_p9 }
  0x13   : > { %686 = shalt.err (!%p683_p11)
}
  0x14   : > { %s687_s26 = scalar_lea.vmem %s126_s15, 6144  ;;  %p695_p1 = scmp.lt.s32.totalorder %s126_s15, %s126_s15 }
  0x15   : > { %p688_p12 = scmp.ne.s32.totalorder %s126_s15, %s687_s26  ;;  %p696_p4 = scmp.lt.s32.totalorder %s687_s26, %s687_s26 }
  0x17   : > { %p690_p13 = pnand %p688_p12, %p676_p7  ;;  %p697_p3 = por %p696_p4, %p695_p1 }
  0x19   : > { %p691_p0 = pneg %p690_p13 }
  0x1b   : > { %p698_p2 = pnand %p697_p3, %p691_p0 }
  0x1d   : > { %701 = shalt.err (!%p698_p2)
}
  0x1e   : > { %s715_s27 = smov 384   ;;  %s716_s28 = smov 24  }
  0x1f   : > { %659 = dma.hbm_to_vmem [thread:$0]  (!%p760_p5), %s835_s1, 6144, %s126_s15, [#allocation3], %s715_s27, %s715_s27, %s716_s28  }
  0x20   : > { %p844_p6 = scmp.ne.s32.totalorder %s841_s16, 0 }
  0x21   : > { %p845_p8 = scmp.ne.s32.totalorder (!%p844_p6), %s842_s17, 0 }
  0x22   : > { %153 = sbr.rel (%p844_p6) target bundleno = 305 (0x131), region = 32 }
  0x29   : > { %707 = dma.done.wait (%p845_p8), [#allocation3], 6144  }
  0x2a   : > { %709 = vsyncadd (%p845_p8), [#allocation3], 4294961152  ;;  %v717_v0 = vmov 0.0   ;;  %s789_s4 = sshll.u32 %s516_s13, 2  ;;  %v196_v1 = vld [vmem:[#allocation2 + $0x8] sm:$0xff]  ;;  %v199_v2 = vld [vmem:[#allocation2 + $0x20] sm:$0xff] }
  0x2b   : > { %324 = vmatprep.mubr.f32.mxu0 %v717_v0  ;;  %v195_v3 = vld [vmem:[#allocation2] sm:$0xff]  ;;  %v587_v4 = vpack.c.bf16 %v199_v2, %v196_v1  ;;  %v198_v5 = vld [vmem:[#allocation2 + $0x18] sm:$0xff]  ;;  %v205_v7 = vld [vmem:[#allocation2 + $0x50] sm:$0xff]  ;;  %p179_p2 = scmp.lt.s32.totalorder %s789_s4, 7 }
  0x2c   : > { %v202_v6 = vld [vmem:[#allocation2 + $0x38] sm:$0xff]  ;;  %v589_v8 = vpack.c.bf16 %v198_v5, %v195_v3  ;;  %v201_v10 = vld [vmem:[#allocation2 + $0x30] sm:$0xff]  ;;  %v204_v11 = vld [vmem:[#allocation2 + $0x48] sm:$0xff] }
  0x2d   : > { %v591_v9 = vpack.c.bf16 %v205_v7, %v202_v6  ;;  %v197_v12 = vld [vmem:[#allocation2 + $0x10] sm:$0xff]  ;;  %588 = vmatprep.subr.bf16.mxu0 %v587_v4  ;;  %v200_v13 = vld [vmem:[#allocation2 + $0x28] sm:$0xff]  ;;  %v211_v15 = vld [vmem:[#allocation2 + $0x80] sm:$0xff]  ;;  %v593_v16 = vpack.c.bf16 %v204_v11, %v201_v10  ;;  %s847_s4 = smov (!%p179_p2, %s789_s4), 7 }
  0x2e   : > { %v208_v14 = vld [vmem:[#allocation2 + $0x68] sm:$0xff]  ;;  %590 = vmatpush1.bf16.msra.mxu0 %v589_v8  ;;  %v619_v17 = vpack.c.bf16 %v200_v13, %v197_v12  ;;  %v203_v18 = vld [vmem:[#allocation2 + $0x40] sm:$0xff]  ;;  %v210_v21 = vld [vmem:[#allocation2 + $0x78] sm:$0xff]  ;;  %s524_s5 = sshll.u32 %s847_s4, 3  ;;  %s651_s11 = smul.u32 24, %s847_s4 }
  0x2f   : > { %592 = vmatprep.subr.bf16.mxu0 %v591_v9  ;;  %v595_v19 = vpack.c.bf16 %v211_v15, %v208_v14  ;;  %v207_v20 = vld [vmem:[#allocation2 + $0x60] sm:$0xff]  ;;  %v206_v22 = vld [vmem:[#allocation2 + $0x58] sm:$0xff]  ;;  %v217_v25 = vld [vmem:[#allocation2 + $0xb0] sm:$0xff]  ;;  %s801_s8 = scalar_lea.vmem %s834_s0, %s524_s5  ;;  %v245_v14 = vlaneseq }
  0x30   : > { %620 = vmatprep.subr.bf16.mxu1 %v619_v17  ;;  %v623_v23 = vpack.c.bf16 %v206_v22, %v203_v18  ;;  %v214_v24 = vld [vmem:[#allocation2 + $0x98] sm:$0xff]  ;;  %v209_v26 = vld [vmem:[#allocation2 + $0x70] sm:$0xff]  ;;  %v212_v27 = vld [vmem:[#allocation2 + $0x88] sm:$0xff]  ;;  %v597_v28 = vpack.c.bf16 %v210_v21, %v207_v20  ;;  %s817_s15 = scalar_lea.vmem %s837_s3, %s651_s11 }
  0x31   : > { %622 = vmatpush3.bf16.msra.mxu1 %v619_v17  ;;  %v213_v29 = vld [vmem:[#allocation2 + $0x90] sm:$0xff]  ;;  %v627_v30 = vpack.c.bf16 %v212_v27, %v209_v26  ;;  %v599_v31 = vpack.c.bf16 %v217_v25, %v214_v24  ;;  %v216_v32 = vld [vmem:[#allocation2 + $0xa8] sm:$0xff]  ;;  %v215_v33 = vld [vmem:[#allocation2 + $0xa0] sm:$0xff]  ;;  %v246_v15 = vshrl.u32 %v245_v14, 7 }
  0x32   : > { %594 = vmatpush1.bf16.msra.mxu0 %v593_v16  ;;  %624 = vmatprep.subr.bf16.mxu1 %v623_v23  ;;  %v218_v34 = vld [vmem:[#allocation2 + $0xb8] sm:$0xff]  ;;  %v220_v35 = vld [vmem:[#allocation2 + $0xc8] sm:$0xff]  ;;  %v223_v36 = vld [vmem:[#allocation2 + $0xe0] sm:$0xff]  ;;  %v601_v37 = vpack.c.bf16 %v216_v32, %v213_v29 }
  0x33   : > { %596 = vmatprep.subr.bf16.mxu0 %v595_v19  ;;  %v219_v38 = vld [vmem:[#allocation2 + $0xc0] sm:$0xff]  ;;  %v631_v39 = vpack.c.bf16 %v218_v34, %v215_v33  ;;  %v603_v40 = vpack.c.bf16 %v223_v36, %v220_v35  ;;  %v222_v41 = vld [vmem:[#allocation2 + $0xd8] sm:$0xff]  ;;  %v221_v42 = vld [vmem:[#allocation2 + $0xd0] sm:$0xff]  ;;  %v247_v16 = vsub.s32 0, %v246_v15  ;;  %v251_v18 = vsub.s32 1, %v246_v15 }
  0x34   : > { %v224_v43 = vld [vmem:[#allocation2 + $0xe8] sm:$0xff]  ;;  %v226_v44 = vld [vmem:[#allocation2 + $0xf8] sm:$0xff]  ;;  %v229_v45 = vld [vmem:[#allocation2 + $0x110] sm:$0xff]  ;;  %v605_v46 = vpack.c.bf16 %v222_v41, %v219_v38  ;;  %v255_v19 = vsub.s32 2, %v246_v15 }
  0x35   : > { %626 = vmatpush3.bf16.msra.mxu1 %v623_v23  ;;  %v225_v47 = vld [vmem:[#allocation2 + $0xf0] sm:$0xff]  ;;  %v635_v48 = vpack.c.bf16 %v224_v43, %v221_v42  ;;  %v191_v49 = vld [vmem:[%s801_s8] sm:$0xff]  ;;  %v607_v50 = vpack.c.bf16 %v229_v45, %v226_v44  ;;  %v228_v51 = vld [vmem:[#allocation2 + $0x108] sm:$0xff] }
  0x36   : > { %598 = vmatpush1.bf16.msra.mxu0 %v597_v28  ;;  %628 = vmatprep.subr.bf16.mxu1 %v627_v30  ;;  %v227_v52 = vld [vmem:[#allocation2 + $0x100] sm:$0xff]  ;;  %v230_v53 = vld [vmem:[#allocation2 + $0x118] sm:$0xff]  ;;  %v232_v54 = vld [vmem:[#allocation2 + $0x128] sm:$0xff]  ;;  %v609_v56 = vpack.c.bf16 %v228_v51, %v225_v47 }
  0x37   : > { %600 = vmatprep.subr.bf16.mxu0 %v599_v31  ;;  %581 = vmatprep.mubr.f32.mxu1 %v191_v49  ;;  %v235_v55 = vld [vmem:[#allocation2 + $0x140] sm:$0xff]  ;;  %v639_v58 = vpack.c.bf16 %v230_v53, %v227_v52  ;;  %v234_v60 = vld [vmem:[#allocation2 + $0x138] sm:$0xff]  ;;  %v233_v61 = vld [vmem:[#allocation2 + $0x130] sm:$0xff] }
  0x38   : > { %v231_v57 = vld [vmem:[#allocation2 + $0x120] sm:$0xff]  ;;  %v611_v59 = vpack.c.bf16 %v235_v55, %v232_v54  ;;  %v236_v62 = vld [vmem:[#allocation2 + $0x148] sm:$0xff]  ;;  %v238_v63 = vld [vmem:[#allocation2 + $0x158] sm:$0xff] }
  0x39   : > { %630 = vmatpush3.bf16.msra.mxu1 %v627_v30  ;;  %v241_v1 = vld [vmem:[#allocation2 + $0x170] sm:$0xff]  ;;  %v613_v2 = vpack.c.bf16 %v234_v60, %v231_v57  ;;  %v643_v4 = vpack.c.bf16 %v236_v62, %v233_v61  ;;  %v240_v6 = vld [vmem:[#allocation2 + $0x168] sm:$0xff]  ;;  %v239_v7 = vld [vmem:[#allocation2 + $0x160] sm:$0xff] }
  0x3a   : > { %602 = vmatpush1.bf16.msra.mxu0 %v601_v37  ;;  %632 = vmatprep.subr.bf16.mxu1 %v631_v39  ;;  %v237_v3 = vld [vmem:[#allocation2 + $0x150] sm:$0xff]  ;;  %v615_v5 = vpack.c.bf16 %v241_v1, %v238_v63  ;;  %v242_v8 = vld [vmem:[#allocation2 + $0x178] sm:$0xff]  ;;  %v192_v11 = vld [vmem:[%s801_s8 + $0x8] sm:$0xff] }
  0x3b   : > { %604 = vmatprep.subr.bf16.mxu0 %v603_v40  ;;  %v617_v9 = vpack.c.bf16 %v240_v6, %v237_v3  ;;  %v647_v10 = vpack.c.bf16 %v242_v8, %v239_v7  ;;  %v193_v12 = vld [vmem:[%s801_s8 + $0x10] sm:$0xff]  ;;  %v194_v13 = vld [vmem:[%s801_s8 + $0x18] sm:$0xff]  ;;  %v243_v17 = vld [vmem:[%s836_s2] sm:$0x7] }
  0x3c   : > { %v248_v20 = vrot.slane %v243_v17, %v247_v16  ;;  %v252_v21 = vrot.slane %v243_v17, %v251_v18  ;;  %v256_v22 = vrot.slane %v243_v17, %v255_v19 }
  0x3d   : > { %634 = vmatpush3.bf16.msra.mxu1 %v631_v39 }
  0x3e   : > { %606 = vmatpush1.bf16.msra.mxu0 %v605_v46  ;;  %636 = vmatprep.subr.bf16.mxu1 %v635_v48 }
  0x3f   : > { %608 = vmatprep.subr.bf16.mxu0 %v607_v50 }
  0x41   : > { %638 = vmatpush3.bf16.msra.mxu1 %v635_v48 }
  0x42   : > { %610 = vmatpush1.bf16.msra.mxu0 %v609_v56  ;;  %640 = vmatprep.subr.bf16.mxu1 %v639_v58 }
  0x43   : > { %612 = vmatprep.subr.bf16.mxu0 %v611_v59 }
  0x45   : > { %642 = vmatpush3.bf16.msra.mxu1 %v639_v58 }
  0x46   : > { %614 = vmatpush1.bf16.msra.mxu0 %v613_v2  ;;  %644 = vmatprep.subr.bf16.mxu1 %v643_v4 }
  0x47   : > { %616 = vmatprep.subr.bf16.mxu0 %v615_v5 }
  0x49   : > { %646 = vmatpush3.bf16.msra.mxu1 %v643_v4 }
  0x4a   : > { %618 = vmatpush1.bf16.msra.mxu0 %v617_v9  ;;  %648 = vmatprep.subr.bf16.mxu1 %v647_v10 }
  0x4d   : > { %325 = vmatmul.mubr.f32.vlgmr.msra.gmra.mrb[0].mxu0 %v191_v49  ;;  %650 = vmatpush3.bf16.msra.mxu1 %v647_v10 }
  0x4e   : > { %330 = vmatprep.mubr.f32.mxu0 %v717_v0 }
  0x50   : > { %582 = vmatmul.mubr.f32.vlgmr.msra.gmra.mrb[0].mxu1 %v192_v11 }
  0x51   : > { %331 = vmatmul.mubr.f32.gmra.mrb[2].mxu0 %v192_v11  ;;  %584 = vmatprep.mubr.f32.mxu1 %v193_v12 }
  0x52   : > { %336 = vmatprep.mubr.f32.mxu0 %v717_v0 }
  0x54   : > { %585 = vmatmul.mubr.f32.gmra.mrb[2].mxu1 %v194_v13 }
  0x55   : > { %337 = vmatmul.mubr.f32.gmra.mrb[4].mxu0 %v193_v12 }
  0x56   : > { %342 = vmatprep.mubr.f32.mxu0 %v717_v0 }
  0x59   : > { %343 = vmatmul.mubr.f32.gmra.mrb[6].mxu0 %v194_v13 }
 0x120   : > { %v326_v0 = vpop.f32.mrb[0].mxu0 }
 0x121   : > { %v327_v23 = vadd.f32 %v326_v0, %v248_v20  ;;  %v328_v24 = vpop.f32.mrb[1].mxu0 }
 0x122   : > { %v329_v25 = vadd.f32 %v328_v24, %v252_v21 }
 0x123   : > { %434 = vst [vmem:[%s817_s15] sm:$0xff] %v327_v23  ;;  %v583_v26 = vpop.f32.mrb[0].mxu1 }
 0x124   : > { %435 = vst [vmem:[%s817_s15 + $0x8] sm:$0xff] %v329_v25  ;;  %v332_v27 = vpop.f32.mrb[2].mxu0  ;;  %v421_v28 = vadd.f32 %v583_v26, %v256_v22  ;;  %v415_v29 = vpop.f32.mrb[1].mxu1 }
 0x125   : > { %v333_v30 = vadd.f32 %v332_v27, %v248_v20  ;;  %v334_v31 = vpop.f32.mrb[3].mxu0  ;;  %v416_v32 = vadd.f32 %v415_v29, %v256_v22 }
 0x126   : > { %v335_v33 = vadd.f32 %v334_v31, %v252_v21  ;;  %439 = vst [vmem:[%s817_s15 + $0x28] sm:$0xff] %v421_v28 }
 0x127   : > { %437 = vst [vmem:[%s817_s15 + $0x18] sm:$0xff] %v333_v30  ;;  %436 = vst [vmem:[%s817_s15 + $0x10] sm:$0xff] %v416_v32  ;;  %v586_v34 = vpop.f32.mrb[2].mxu1 }
 0x128   : > { %438 = vst [vmem:[%s817_s15 + $0x20] sm:$0xff] %v335_v33  ;;  %v338_v35 = vpop.f32.mrb[4].mxu0  ;;  %v431_v36 = vadd.f32 %v586_v34, %v256_v22  ;;  %v425_v37 = vpop.f32.mrb[3].mxu1 }
 0x129   : > { %v339_v38 = vadd.f32 %v338_v35, %v248_v20  ;;  %v340_v39 = vpop.f32.mrb[5].mxu0  ;;  %v426_v40 = vadd.f32 %v425_v37, %v256_v22 }
 0x12a   : > { %v341_v41 = vadd.f32 %v340_v39, %v252_v21  ;;  %445 = vst [vmem:[%s817_s15 + $0x58] sm:$0xff] %v431_v36 }
 0x12b   : > { %440 = vst [vmem:[%s817_s15 + $0x30] sm:$0xff] %v339_v38  ;;  %442 = vst [vmem:[%s817_s15 + $0x40] sm:$0xff] %v426_v40 }
 0x12c   : > { %441 = vst [vmem:[%s817_s15 + $0x38] sm:$0xff] %v341_v41  ;;  %v344_v42 = vpop.f32.mrb[6].mxu0 }
 0x12d   : > { %v345_v43 = vadd.f32 %v344_v42, %v248_v20  ;;  %v346_v44 = vpop.f32.mrb[7].mxu0 }
 0x12e   : > { %v347_v45 = vadd.f32 %v346_v44, %v252_v21 }
 0x12f   : > { %443 = vst [vmem:[%s817_s15 + $0x48] sm:$0xff] %v345_v43 }
 0x130   : > { %444 = vst [vmem:[%s817_s15 + $0x50] sm:$0xff] %v347_v45 }
 0x131 PF: > { %s14_s12 = sadd.s32 1, %s712_s12  }
 0x132   : > { %p11_p3 = scmp.ge.s32.totalorder %s14_s12, 4  }
 0x134   :  { %13 = sbr.rel (!%p11_p3) target bundleno = 1 (0x1), region = 67 }
 0x13b   :  { %470 = vsyncpa [#allocation3], 1 }
 0x13c   :  { %472 = vsyncpa [#allocation3 + $0x1], 1 }

</bundles_post_ra>
